<compile_context>
chip_gen: v5e
topology: v5e:2x2
jax: 0.10.0
libtpu: 0.0.40
codegen_flags: <defaults>
</compile_context>

<pallas_src>
import numpy as np
import jax
import jax.numpy as jnp
from jax.experimental import pallas as pl
from jax.experimental.pallas import tpu as pltpu

BN_EPS = 1e-5


# --------------------------------------------------------------------------- #
# Kernel
# --------------------------------------------------------------------------- #
def make_vae_kernel(layout):
    """Build the fused VAE-forward kernel for a fixed (static) layer layout."""
    input_dim = layout["input_dim"]
    latent_dim = layout["latent_dim"]
    enc_layers = layout["enc"]      # list of dicts: w_off, d_in, d_out, b_row, g_row, bt_row
    head = layout["head"]           # dict: w_off, d_in, b_row   (fused mu|logvar, width 2*latent)
    dec_layers = layout["dec"]      # list of dicts: w_off, d_in, d_out, b_row
    cb_row = layout["cb_row"]

    def dot_bf16(a, w):
        # bf16 MXU passes, f32 accumulation.
        return jnp.dot(a.astype(jnp.bfloat16), w.astype(jnp.bfloat16),
                       preferred_element_type=jnp.float32)

    def bn_stats(h):
        # single reduction pass: biased batch variance via E[x^2] - mean^2
        mean = jnp.mean(h, axis=0, keepdims=True)
        meansq = jnp.mean(h * h, axis=0, keepdims=True)
        var = meansq - mean * mean
        return mean, var

    def kernel(xe_ref, w_ref, v_ref, out_ref):
        # lane-packed input: [ x | eps ]
        x = xe_ref[:, :input_dim]
        eps = xe_ref[:, input_dim:input_dim + latent_dim]

        # -------- encoder: [Linear -> BatchNorm1d -> ReLU] * L (f32 BN math) --------
        h = x
        for L in enc_layers:
            w = w_ref[L["w_off"]:L["w_off"] + L["d_in"], :L["d_out"]]
            b = v_ref[L["b_row"]:L["b_row"] + 1, :L["d_out"]]
            g = v_ref[L["g_row"]:L["g_row"] + 1, :L["d_out"]]
            bt = v_ref[L["bt_row"]:L["bt_row"] + 1, :L["d_out"]]
            h = dot_bf16(h, w) + b
            mean, var = bn_stats(h)
            h = (h - mean) * jax.lax.rsqrt(var + BN_EPS) * g + bt
            h = jnp.maximum(h, 0.0)

        # -------- fused latent heads (one matmul for mu|logvar) + reparameterize ----
        hw = w_ref[head["w_off"]:head["w_off"] + head["d_in"], :2 * latent_dim]
        hb = v_ref[head["b_row"]:head["b_row"] + 1, :2 * latent_dim]
        ml = dot_bf16(h, hw) + hb
        mu = ml[:, :latent_dim]
        lv = ml[:, latent_dim:2 * latent_dim]
        z = mu + jnp.exp(0.5 * lv) * eps          # exp stays f32 (EUP)

        # -------- decoder: [Linear -> ReLU] * L  +  final Linear ---------------------
        d = z
        n_dec = len(dec_layers)
        for i, L in enumerate(dec_layers):
            w = w_ref[L["w_off"]:L["w_off"] + L["d_in"], :L["d_out"]]
            b = v_ref[L["b_row"]:L["b_row"] + 1, :L["d_out"]]
            d = dot_bf16(d, w) + b
            if i < n_dec - 1:
                d = jnp.maximum(d, 0.0)

        # -------- center_bias + post_norm: BatchNorm1d(affine=False), training mode --
        cb = v_ref[cb_row:cb_row + 1, :input_dim]
        out = d + cb
        m, v = bn_stats(out)
        out_n = (out - m) * jax.lax.rsqrt(v + BN_EPS)

        # single lane-packed store: [ post_norm(out) | mu | logvar ]
        out_ref[...] = jnp.concatenate([out_n, mu, lv], axis=-1)

    return kernel


# --------------------------------------------------------------------------- #
# Parameter init (PyTorch-style Linear / BatchNorm defaults, deterministic)
# --------------------------------------------------------------------------- #
def init_linear(key, d_in, d_out):
    k_w, k_b = jax.random.split(key)
    bound = 1.0 / np.sqrt(d_in)
    w = jax.random.uniform(k_w, (d_in, d_out), jnp.float32, -bound, bound)
    b = jax.random.uniform(k_b, (1, d_out), jnp.float32, -bound, bound)
    return w, b


def init_vae_params(key, input_dim, hidden_dims, latent_dim):
    params = {"enc": [], "dec": []}
    d = input_dim
    for h in hidden_dims:
        key, k = jax.random.split(key)
        w, b = init_linear(k, d, h)
        gamma = jnp.ones((1, h), jnp.float32)
        beta = jnp.zeros((1, h), jnp.float32)
        params["enc"].append((w, b, gamma, beta))
        d = h
    key, k_mu, k_lv = jax.random.split(key, 3)
    params["fc_mu"] = init_linear(k_mu, d, latent_dim)
    params["fc_logvar"] = init_linear(k_lv, d, latent_dim)
    d = latent_dim
    for h in reversed(hidden_dims):
        key, k = jax.random.split(key)
        params["dec"].append(init_linear(k, d, h))
        d = h
    key, k = jax.random.split(key)
    params["dec"].append(init_linear(k, d, input_dim))
    params["center_bias"] = jnp.zeros((1, input_dim), jnp.float32)
    return params


# --------------------------------------------------------------------------- #
# Packing: all weights -> one 2D slab, all vectors -> one 2D slab
# --------------------------------------------------------------------------- #
def pack_params(params, input_dim, hidden_dims, latent_dim):
    max_w = int(max(list(hidden_dims) + [2 * latent_dim, input_dim]))

    w_blocks, v_rows = [], []
    w_off = 0

    def add_w(w_np):
        nonlocal w_off
        d_in, d_out = w_np.shape
        rows = int(np.ceil(d_in / 8) * 8)          # keep row offsets 8-aligned
        blk = np.zeros((rows, max_w), np.float32)
        blk[:d_in, :d_out] = w_np
        w_blocks.append(blk)
        off = w_off
        w_off += rows
        return off, d_in, d_out

    def add_v(v_np):
        row = np.zeros((max_w,), np.float32)
        flat = np.asarray(v_np, np.float32).reshape(-1)
        row[:flat.shape[0]] = flat
        v_rows.append(row)
        return len(v_rows) - 1

    layout = {"input_dim": input_dim, "latent_dim": latent_dim,
              "enc": [], "dec": []}

    for (w, b, g, bt) in params["enc"]:
        off, d_in, d_out = add_w(np.asarray(w))
        layout["enc"].append({
            "w_off": off, "d_in": d_in, "d_out": d_out,
            "b_row": add_v(b), "g_row": add_v(g), "bt_row": add_v(bt),
        })

    # fused mu | logvar head
    w_mu, b_mu = params["fc_mu"]
    w_lv, b_lv = params["fc_logvar"]
    w_head = np.concatenate([np.asarray(w_mu), np.asarray(w_lv)], axis=1)
    b_head = np.concatenate([np.asarray(b_mu), np.asarray(b_lv)], axis=1)
    off, d_in, _ = add_w(w_head)
    layout["head"] = {"w_off": off, "d_in": d_in, "b_row": add_v(b_head)}

    for (w, b) in params["dec"]:
        off, d_in, d_out = add_w(np.asarray(w))
        layout["dec"].append({"w_off": off, "d_in": d_in, "d_out": d_out,
                              "b_row": add_v(b)})

    layout["cb_row"] = add_v(params["center_bias"])

    W_pack = jnp.asarray(np.concatenate(w_blocks, axis=0))
    V_pack = jnp.asarray(np.stack(v_rows, axis=0))
    return W_pack, V_pack, layout


# --------------------------------------------------------------------------- #
# Wrapper
# --------------------------------------------------------------------------- #
def vae_forward(x, eps, W_pack, V_pack, layout):
    n, input_dim = x.shape
    latent_dim = layout["latent_dim"]
    out_w = input_dim + 2 * latent_dim

    xe = jnp.concatenate([x, eps], axis=-1)        # lane-packed [x | eps]
    kernel = make_vae_kernel(layout)

    vmem = pl.BlockSpec(memory_space=pltpu.MemorySpace.VMEM)
    packed_out = pl.pallas_call(
        kernel,
        out_shape=jax.ShapeDtypeStruct((n, out_w), jnp.float32),
        in_specs=[vmem, vmem, vmem],
        out_specs=vmem,
        # Tiny, fully VMEM-resident problem -> no grid.
        # TODO(synk): if batch/hidden dims are scaled up, add a 'parallel' batch
        # grid with two-pass BN stats and budget VMEM for v7x (64 MiB).
    )(xe, W_pack, V_pack)

    post = packed_out[:, :input_dim]
    mu = packed_out[:, input_dim:input_dim + latent_dim]
    lv = packed_out[:, input_dim + latent_dim:]
    return post, mu, lv


# --------------------------------------------------------------------------- #
# Main
# --------------------------------------------------------------------------- #
if __name__ == "__main__":
    INPUT_DIM = 16
    HIDDEN_DIMS = (32, 32)
    LATENT_DIM = 8
    BATCH = 8

    root = jax.random.PRNGKey(0)
    k_params, k_x, k_eps = jax.random.split(root, 3)

    params = init_vae_params(k_params, INPUT_DIM, HIDDEN_DIMS, LATENT_DIM)
    W_pack, V_pack, layout = pack_params(params, INPUT_DIM, HIDDEN_DIMS, LATENT_DIM)

    x = jax.random.normal(k_x, (BATCH, INPUT_DIM), jnp.float32)
    # torch.randn_like(mu) equivalent, generated in the wrapper, consumed in-kernel.
    eps = jax.random.normal(k_eps, (BATCH, LATENT_DIM), jnp.float32)

    out, mu, lv = vae_forward(x, eps, W_pack, V_pack, layout)
    jax.block_until_ready((out, mu, lv))

    assert out.shape == (BATCH, INPUT_DIM)
    assert mu.shape == (BATCH, LATENT_DIM)
    assert lv.shape == (BATCH, LATENT_DIM)
    assert bool(jnp.all(jnp.isfinite(out))) and bool(jnp.all(jnp.isfinite(mu))) \
        and bool(jnp.all(jnp.isfinite(lv)))
    print("KERNEL_OK")
</pallas_src>

<mosaic_0001>
module attributes {stable_mosaic.version = 11 : i64} {
  func.func @kernel(%arg0: memref<8x24xf32, #tpu.memory_space<vmem>>, %arg1: memref<152x32xf32, #tpu.memory_space<vmem>>, %arg2: memref<11x32xf32, #tpu.memory_space<vmem>>, %arg3: memref<8x32xf32, #tpu.memory_space<vmem>>) attributes {dimension_semantics = [], scalar_prefetch = 0 : i64, scratch_operands = 0 : i64, tpu.core_type = #tpu.core_type<tc>} {
    %c0 = arith.constant 0 : index
    %c0_0 = arith.constant 0 : index
    %0 = vector.load %arg0[%c0, %c0_0] : memref<8x24xf32, #tpu.memory_space<vmem>>, vector<8x16xf32>
    %c0_1 = arith.constant 0 : index
    %c16 = arith.constant 16 : index
    %1 = vector.load %arg0[%c0_1, %c16] : memref<8x24xf32, #tpu.memory_space<vmem>>, vector<8x8xf32>
    %c0_2 = arith.constant 0 : index
    %c0_3 = arith.constant 0 : index
    %2 = vector.load %arg1[%c0_2, %c0_3] : memref<152x32xf32, #tpu.memory_space<vmem>>, vector<16x32xf32>
    %c0_4 = arith.constant 0 : index
    %c0_5 = arith.constant 0 : index
    %3 = vector.load %arg2[%c0_4, %c0_5] : memref<11x32xf32, #tpu.memory_space<vmem>>, vector<1x32xf32>
    %c1 = arith.constant 1 : index
    %c0_6 = arith.constant 0 : index
    %4 = vector.load %arg2[%c1, %c0_6] : memref<11x32xf32, #tpu.memory_space<vmem>>, vector<1x32xf32>
    %c2 = arith.constant 2 : index
    %c0_7 = arith.constant 0 : index
    %5 = vector.load %arg2[%c2, %c0_7] : memref<11x32xf32, #tpu.memory_space<vmem>>, vector<1x32xf32>
    %6 = arith.truncf %0 : vector<8x16xf32> to vector<8x16xbf16>
    %7 = arith.truncf %2 : vector<16x32xf32> to vector<16x32xbf16>
    %cst = arith.constant dense<0.000000e+00> : vector<8x32xf32>
    %8 = tpu.matmul %6, %7, %cst {dimension_numbers = #tpu.dot_dimension_numbers<[1], [0], [0], [1], [0, 0, 1, 1], [], []>} : vector<8x16xbf16>, vector<16x32xbf16>, vector<8x32xf32> -> vector<8x32xf32>
    %9 = vector.broadcast %3 : vector<1x32xf32> to vector<8x32xf32>
    %10 = arith.addf %8, %9 : vector<8x32xf32>
    %cst_8 = arith.constant dense<0.000000e+00> : vector<32xf32>
    %11 = vector.multi_reduction <add>, %10, %cst_8 [0] : vector<8x32xf32> to vector<32xf32>
    %12 = vector.shape_cast %11 : vector<32xf32> to vector<1x32xf32>
    %cst_9 = arith.constant 8.000000e+00 : f32
    %13 = vector.broadcast %cst_9 : f32 to vector<1x32xf32>
    %14 = arith.divf %12, %13 : vector<1x32xf32>
    %15 = arith.mulf %10, %10 : vector<8x32xf32>
    %cst_10 = arith.constant dense<0.000000e+00> : vector<32xf32>
    %16 = vector.multi_reduction <add>, %15, %cst_10 [0] : vector<8x32xf32> to vector<32xf32>
    %17 = vector.shape_cast %16 : vector<32xf32> to vector<1x32xf32>
    %cst_11 = arith.constant 8.000000e+00 : f32
    %18 = vector.broadcast %cst_11 : f32 to vector<1x32xf32>
    %19 = arith.divf %17, %18 : vector<1x32xf32>
    %20 = arith.mulf %14, %14 : vector<1x32xf32>
    %21 = arith.subf %19, %20 : vector<1x32xf32>
    %22 = vector.broadcast %14 : vector<1x32xf32> to vector<8x32xf32>
    %23 = arith.subf %10, %22 : vector<8x32xf32>
    %cst_12 = arith.constant 9.99999974E-6 : f32
    %24 = vector.broadcast %cst_12 : f32 to vector<1x32xf32>
    %25 = arith.addf %21, %24 : vector<1x32xf32>
    %26 = math.rsqrt %25 : vector<1x32xf32>
    %27 = vector.broadcast %26 : vector<1x32xf32> to vector<8x32xf32>
    %28 = arith.mulf %23, %27 : vector<8x32xf32>
    %29 = vector.broadcast %4 : vector<1x32xf32> to vector<8x32xf32>
    %30 = arith.mulf %28, %29 : vector<8x32xf32>
    %31 = vector.broadcast %5 : vector<1x32xf32> to vector<8x32xf32>
    %32 = arith.addf %30, %31 : vector<8x32xf32>
    %cst_13 = arith.constant 0.000000e+00 : f32
    %33 = vector.broadcast %cst_13 : f32 to vector<8x32xf32>
    %34 = arith.maximumf %32, %33 : vector<8x32xf32>
    %c16_14 = arith.constant 16 : index
    %c0_15 = arith.constant 0 : index
    %35 = vector.load %arg1[%c16_14, %c0_15] : memref<152x32xf32, #tpu.memory_space<vmem>>, vector<32x32xf32>
    %c3 = arith.constant 3 : index
    %c0_16 = arith.constant 0 : index
    %36 = vector.load %arg2[%c3, %c0_16] : memref<11x32xf32, #tpu.memory_space<vmem>>, vector<1x32xf32>
    %c4 = arith.constant 4 : index
    %c0_17 = arith.constant 0 : index
    %37 = vector.load %arg2[%c4, %c0_17] : memref<11x32xf32, #tpu.memory_space<vmem>>, vector<1x32xf32>
    %c5 = arith.constant 5 : index
    %c0_18 = arith.constant 0 : index
    %38 = vector.load %arg2[%c5, %c0_18] : memref<11x32xf32, #tpu.memory_space<vmem>>, vector<1x32xf32>
    %39 = arith.truncf %34 : vector<8x32xf32> to vector<8x32xbf16>
    %40 = arith.truncf %35 : vector<32x32xf32> to vector<32x32xbf16>
    %cst_19 = arith.constant dense<0.000000e+00> : vector<8x32xf32>
    %41 = tpu.matmul %39, %40, %cst_19 {dimension_numbers = #tpu.dot_dimension_numbers<[1], [0], [0], [1], [0, 0, 1, 1], [], []>} : vector<8x32xbf16>, vector<32x32xbf16>, vector<8x32xf32> -> vector<8x32xf32>
    %42 = vector.broadcast %36 : vector<1x32xf32> to vector<8x32xf32>
    %43 = arith.addf %41, %42 : vector<8x32xf32>
    %cst_20 = arith.constant dense<0.000000e+00> : vector<32xf32>
    %44 = vector.multi_reduction <add>, %43, %cst_20 [0] : vector<8x32xf32> to vector<32xf32>
    %45 = vector.shape_cast %44 : vector<32xf32> to vector<1x32xf32>
    %cst_21 = arith.constant 8.000000e+00 : f32
    %46 = vector.broadcast %cst_21 : f32 to vector<1x32xf32>
    %47 = arith.divf %45, %46 : vector<1x32xf32>
    %48 = arith.mulf %43, %43 : vector<8x32xf32>
    %cst_22 = arith.constant dense<0.000000e+00> : vector<32xf32>
    %49 = vector.multi_reduction <add>, %48, %cst_22 [0] : vector<8x32xf32> to vector<32xf32>
    %50 = vector.shape_cast %49 : vector<32xf32> to vector<1x32xf32>
    %cst_23 = arith.constant 8.000000e+00 : f32
    %51 = vector.broadcast %cst_23 : f32 to vector<1x32xf32>
    %52 = arith.divf %50, %51 : vector<1x32xf32>
    %53 = arith.mulf %47, %47 : vector<1x32xf32>
    %54 = arith.subf %52, %53 : vector<1x32xf32>
    %55 = vector.broadcast %47 : vector<1x32xf32> to vector<8x32xf32>
    %56 = arith.subf %43, %55 : vector<8x32xf32>
    %cst_24 = arith.constant 9.99999974E-6 : f32
    %57 = vector.broadcast %cst_24 : f32 to vector<1x32xf32>
    %58 = arith.addf %54, %57 : vector<1x32xf32>
    %59 = math.rsqrt %58 : vector<1x32xf32>
    %60 = vector.broadcast %59 : vector<1x32xf32> to vector<8x32xf32>
    %61 = arith.mulf %56, %60 : vector<8x32xf32>
    %62 = vector.broadcast %37 : vector<1x32xf32> to vector<8x32xf32>
    %63 = arith.mulf %61, %62 : vector<8x32xf32>
    %64 = vector.broadcast %38 : vector<1x32xf32> to vector<8x32xf32>
    %65 = arith.addf %63, %64 : vector<8x32xf32>
    %cst_25 = arith.constant 0.000000e+00 : f32
    %66 = vector.broadcast %cst_25 : f32 to vector<8x32xf32>
    %67 = arith.maximumf %65, %66 : vector<8x32xf32>
    %c48 = arith.constant 48 : index
    %c0_26 = arith.constant 0 : index
    %68 = vector.load %arg1[%c48, %c0_26] : memref<152x32xf32, #tpu.memory_space<vmem>>, vector<32x16xf32>
    %c6 = arith.constant 6 : index
    %c0_27 = arith.constant 0 : index
    %69 = vector.load %arg2[%c6, %c0_27] : memref<11x32xf32, #tpu.memory_space<vmem>>, vector<1x16xf32>
    %70 = arith.truncf %67 : vector<8x32xf32> to vector<8x32xbf16>
    %71 = arith.truncf %68 : vector<32x16xf32> to vector<32x16xbf16>
    %cst_28 = arith.constant dense<0.000000e+00> : vector<8x16xf32>
    %72 = tpu.matmul %70, %71, %cst_28 {dimension_numbers = #tpu.dot_dimension_numbers<[1], [0], [0], [1], [0, 0, 1, 1], [], []>} : vector<8x32xbf16>, vector<32x16xbf16>, vector<8x16xf32> -> vector<8x16xf32>
    %73 = vector.broadcast %69 : vector<1x16xf32> to vector<8x16xf32>
    %74 = arith.addf %72, %73 : vector<8x16xf32>
    %75 = vector.extract_strided_slice %74 {offsets = [0, 0], sizes = [8, 8], strides = [1, 1]} : vector<8x16xf32> to vector<8x8xf32>
    %76 = vector.extract_strided_slice %74 {offsets = [0, 8], sizes = [8, 8], strides = [1, 1]} : vector<8x16xf32> to vector<8x8xf32>
    %cst_29 = arith.constant 5.000000e-01 : f32
    %77 = vector.broadcast %cst_29 : f32 to vector<8x8xf32>
    %78 = arith.mulf %77, %76 : vector<8x8xf32>
    %79 = math.exp %78 : vector<8x8xf32>
    %80 = arith.mulf %79, %1 : vector<8x8xf32>
    %81 = arith.addf %75, %80 : vector<8x8xf32>
    %c80 = arith.constant 80 : index
    %c0_30 = arith.constant 0 : index
    %82 = vector.load %arg1[%c80, %c0_30] : memref<152x32xf32, #tpu.memory_space<vmem>>, vector<8x32xf32>
    %c7 = arith.constant 7 : index
    %c0_31 = arith.constant 0 : index
    %83 = vector.load %arg2[%c7, %c0_31] : memref<11x32xf32, #tpu.memory_space<vmem>>, vector<1x32xf32>
    %84 = arith.truncf %81 : vector<8x8xf32> to vector<8x8xbf16>
    %85 = arith.truncf %82 : vector<8x32xf32> to vector<8x32xbf16>
    %cst_32 = arith.constant dense<0.000000e+00> : vector<8x32xf32>
    %86 = tpu.matmul %84, %85, %cst_32 {dimension_numbers = #tpu.dot_dimension_numbers<[1], [0], [0], [1], [0, 0, 1, 1], [], []>} : vector<8x8xbf16>, vector<8x32xbf16>, vector<8x32xf32> -> vector<8x32xf32>
    %87 = vector.broadcast %83 : vector<1x32xf32> to vector<8x32xf32>
    %88 = arith.addf %86, %87 : vector<8x32xf32>
    %cst_33 = arith.constant 0.000000e+00 : f32
    %89 = vector.broadcast %cst_33 : f32 to vector<8x32xf32>
    %90 = arith.maximumf %88, %89 : vector<8x32xf32>
    %c88 = arith.constant 88 : index
    %c0_34 = arith.constant 0 : index
    %91 = vector.load %arg1[%c88, %c0_34] : memref<152x32xf32, #tpu.memory_space<vmem>>, vector<32x32xf32>
    %c8 = arith.constant 8 : index
    %c0_35 = arith.constant 0 : index
    %92 = vector.load %arg2[%c8, %c0_35] : memref<11x32xf32, #tpu.memory_space<vmem>>, vector<1x32xf32>
    %93 = arith.truncf %90 : vector<8x32xf32> to vector<8x32xbf16>
    %94 = arith.truncf %91 : vector<32x32xf32> to vector<32x32xbf16>
    %cst_36 = arith.constant dense<0.000000e+00> : vector<8x32xf32>
    %95 = tpu.matmul %93, %94, %cst_36 {dimension_numbers = #tpu.dot_dimension_numbers<[1], [0], [0], [1], [0, 0, 1, 1], [], []>} : vector<8x32xbf16>, vector<32x32xbf16>, vector<8x32xf32> -> vector<8x32xf32>
    %96 = vector.broadcast %92 : vector<1x32xf32> to vector<8x32xf32>
    %97 = arith.addf %95, %96 : vector<8x32xf32>
    %cst_37 = arith.constant 0.000000e+00 : f32
    %98 = vector.broadcast %cst_37 : f32 to vector<8x32xf32>
    %99 = arith.maximumf %97, %98 : vector<8x32xf32>
    %c120 = arith.constant 120 : index
    %c0_38 = arith.constant 0 : index
    %100 = vector.load %arg1[%c120, %c0_38] : memref<152x32xf32, #tpu.memory_space<vmem>>, vector<32x16xf32>
    %c9 = arith.constant 9 : index
    %c0_39 = arith.constant 0 : index
    %101 = vector.load %arg2[%c9, %c0_39] : memref<11x32xf32, #tpu.memory_space<vmem>>, vector<1x16xf32>
    %102 = arith.truncf %99 : vector<8x32xf32> to vector<8x32xbf16>
    %103 = arith.truncf %100 : vector<32x16xf32> to vector<32x16xbf16>
    %cst_40 = arith.constant dense<0.000000e+00> : vector<8x16xf32>
    %104 = tpu.matmul %102, %103, %cst_40 {dimension_numbers = #tpu.dot_dimension_numbers<[1], [0], [0], [1], [0, 0, 1, 1], [], []>} : vector<8x32xbf16>, vector<32x16xbf16>, vector<8x16xf32> -> vector<8x16xf32>
    %105 = vector.broadcast %101 : vector<1x16xf32> to vector<8x16xf32>
    %106 = arith.addf %104, %105 : vector<8x16xf32>
    %c10 = arith.constant 10 : index
    %c0_41 = arith.constant 0 : index
    %107 = vector.load %arg2[%c10, %c0_41] : memref<11x32xf32, #tpu.memory_space<vmem>>, vector<1x16xf32>
    %108 = vector.broadcast %107 : vector<1x16xf32> to vector<8x16xf32>
    %109 = arith.addf %106, %108 : vector<8x16xf32>
    %cst_42 = arith.constant dense<0.000000e+00> : vector<16xf32>
    %110 = vector.multi_reduction <add>, %109, %cst_42 [0] : vector<8x16xf32> to vector<16xf32>
    %111 = vector.shape_cast %110 : vector<16xf32> to vector<1x16xf32>
    %cst_43 = arith.constant 8.000000e+00 : f32
    %112 = vector.broadcast %cst_43 : f32 to vector<1x16xf32>
    %113 = arith.divf %111, %112 : vector<1x16xf32>
    %114 = arith.mulf %109, %109 : vector<8x16xf32>
    %cst_44 = arith.constant dense<0.000000e+00> : vector<16xf32>
    %115 = vector.multi_reduction <add>, %114, %cst_44 [0] : vector<8x16xf32> to vector<16xf32>
    %116 = vector.shape_cast %115 : vector<16xf32> to vector<1x16xf32>
    %cst_45 = arith.constant 8.000000e+00 : f32
    %117 = vector.broadcast %cst_45 : f32 to vector<1x16xf32>
    %118 = arith.divf %116, %117 : vector<1x16xf32>
    %119 = arith.mulf %113, %113 : vector<1x16xf32>
    %120 = arith.subf %118, %119 : vector<1x16xf32>
    %121 = vector.broadcast %113 : vector<1x16xf32> to vector<8x16xf32>
    %122 = arith.subf %109, %121 : vector<8x16xf32>
    %cst_46 = arith.constant 9.99999974E-6 : f32
    %123 = vector.broadcast %cst_46 : f32 to vector<1x16xf32>
    %124 = arith.addf %120, %123 : vector<1x16xf32>
    %125 = math.rsqrt %124 : vector<1x16xf32>
    %126 = vector.broadcast %125 : vector<1x16xf32> to vector<8x16xf32>
    %127 = arith.mulf %122, %126 : vector<8x16xf32>
    %128 = tpu.concatenate %127, %75, %76 in 1 : vector<8x16xf32>, vector<8x8xf32>, vector<8x8xf32> -> vector<8x32xf32>
    %c0_47 = arith.constant 0 : index
    %c0_48 = arith.constant 0 : index
    %129 = vector.load %arg3[%c0_47, %c0_48] : memref<8x32xf32, #tpu.memory_space<vmem>>, vector<8x32xf32>
    tpu.vector_store %arg3[%c0_47, %c0_48], %128 {strides = array<i32>} : memref<8x32xf32, #tpu.memory_space<vmem>>, vector<8x32xf32>,
    return
  }
}

</mosaic_0001>

<bundles_post_ra>
// kernel: tpu_custom_call.1
= control target key start
LH: loop header
LB: loop body
LE: loop exit
PB: predicated region body
PF: predicated region fallthrough
CT: control target
= control target key end

     0   :  { %vm25_vm0 = vcmask 130048   ;;  %s531_s0 = inlined_call_operand.vmem [shape: f32[8,24], index: 0, kind: input, shape index: {}]   ;;  %s532_s1 = inlined_call_operand.vmem [shape: f32[152,32], index: 1, kind: input, shape index: {}]   ;;  %s533_s2 = inlined_call_operand.vmem [shape: f32[11,32], index: 2, kind: input, shape index: {}]   ;;  %s534_s3 = inlined_call_operand.hbm [shape: f32[8,32], index: 3, kind: output, shape index: {}]  }
   0x1   :  { %v17_v0 = vld [vmem:[%s532_s1] sm:$0xff]  ;;  %v18_v1 = vld [vmem:[%s532_s1 + $0x8] sm:$0xff] }
   0x2   :  { %v416_v2 = vld [vmem:[%s531_s0] sm:$0xff]  ;;  %v23_v3 = vpack.c.bf16 %v18_v1, %v17_v0 }
   0x3   :  { %v22_v4 = vpack.c.bf16 %v416_v2, %v416_v2 }
   0x4   :  { %36 = vmatpush.bf16.msra.mxu0 %v23_v3 }
   0x5   :  { %8 = vsyncpa [#allocation3], 0  ;;  %v383_v5 = vmov 8.0   ;;  %v336_v7 = vld [vmem:[%s533_s2] ss:$0 sm:$0xff]  ;;  %vm42_vm1 = vcmask 261120  }
   0x6   :  { %347 = vrcp.f32 %v383_v5  ;;  %v89_v25 = vld [vmem:[%s532_s1 + $0x20] sm:$0xff]  ;;  %v90_v26 = vld [vmem:[%s532_s1 + $0x28] sm:$0xff]  ;;  %v87_v27 = vld [vmem:[%s532_s1 + $0x10] sm:$0xff]  ;;  %s384_s4 = smov 120   ;;  %s385_s20 = smov 16   ;;  %vm198_vm9 = vcmask 1043456  }
   0x7   :  { %326 = vmatmul.msk.bf16.vlgmr.msra.gmra.mxu0 %vm25_vm0, %v22_v4  ;;  %v96_v28 = vpack.c.bf16 %v90_v26, %v89_v25  ;;  %v88_v29 = vld [vmem:[%s532_s1 + $0x18] sm:$0xff]  ;;  %v337_v49 = vld [vmem:[%s533_s2 + $0x1] ss:$0 sm:$0xff]  ;;  %v338_v52 = vld [vmem:[%s533_s2 + $0x2] ss:$0 sm:$0xff]  ;;  %180 = vrot.lane.b32.xlu0 %v416_v2, %s384_s4  ;;  %vm194_vm10 = vcmask 64512  }
   0x8   :  { %v95_v33 = vpack.c.bf16 %v88_v29, %v87_v27  ;;  %v339_v57 = vld [vmem:[%s533_s2 + $0x3] ss:$0 sm:$0xff]  ;;  %s317_s21 = sshll.u32 %s534_s3, 4  ;;  %vm307_vm14 = vcmask 195584   ;;  %s318_s21 = int_to_ptr.hbm [resolvable:$true] %s317_s21 }
   0x9   :  { %107 = vmatpush.bf16.msra.mxu1 %v96_v28  ;;  %v153_v2 = vld [vmem:[%s532_s1 + $0x40] sm:$0xff] }
   0xc   :  { %v348_v6 = vpop.eup %347 }
   0xd   :  { %v51_v8 = vmul.f32 8.0, %v348_v6  ;;  %vm55_vm2 = vweird.f32 %v348_v6  ;;  %108 = vmatpush.bf16.msra.mxu1 %v95_v33 }
   0xf   :  { %v52_v11 = vsub.f32 1.0, %v51_v8  ;;  %v154_v8 = vld [vmem:[%s532_s1 + $0x48] sm:$0xff] }
  0x11   :  { %v53_v15 = vmul.f32 %v348_v6, %v52_v11  ;;  %v152_v11 = vld [vmem:[%s532_s1 + $0x38] sm:$0xff] }
  0x13   :  { %v54_v22 = vadd.f32 %v348_v6, %v53_v15 }
  0x15   :  { %v438_v32 = vsel %vm55_vm2, %v348_v6, %v54_v22 }
  0x84   :  { %v38_v9 = vpop.f32.mrf.mxu0 }
  0x85   :  { %v39_v10 = vadd.f32 %v336_v7, %v38_v9  ;;  %v151_v9 = vld [vmem:[%s532_s1 + $0x30] sm:$0xff] }
  0x87   :  { %v43_v12 = vsel %vm42_vm1, %v39_v10, 0.0  ;;  %v58_v13 = vmul.f32 %v39_v10, %v39_v10 }
  0x88   :  { %v44_v14 = vrot.slane %v43_v12, 4 }
  0x89   :  { %v59_v16 = vsel %vm42_vm1, %v58_v13, 0.0 }
  0x8a   :  { %v45_v17 = vadd.f32 %v44_v14, %v43_v12  ;;  %v60_v18 = vrot.slane %v59_v16, 4  ;;  %v157_v14 = vpack.c.bf16 %v152_v11, %v151_v9 }
  0x8c   :  { %v46_v19 = vrot.slane %v45_v17, 2  ;;  %v61_v20 = vadd.f32 %v60_v18, %v59_v16  ;;  %v40_v21 = vpop.f32.mrf.mxu0 }
  0x8e   :  { %v47_v23 = vadd.f32 %v46_v19, %v45_v17  ;;  %v62_v24 = vrot.slane %v61_v20, 2 }
  0x90   :  { %v48_v30 = vrot.slane %v47_v23, 1  ;;  %v63_v31 = vadd.f32 %v62_v24, %v61_v20 }
  0x92   :  { %v49_v34 = vadd.f32 %v48_v30, %v47_v23  ;;  %v64_v35 = vrot.slane %v63_v31, 1  ;;  %v340_v30 = vld [vmem:[%s533_s2 + $0x4] ss:$0 sm:$0xff] }
  0x94   :  { %v57_v36 = vmul.f32 %v438_v32, %v49_v34  ;;  %v65_v37 = vadd.f32 %v64_v35, %v63_v31  ;;  %v341_v34 = vld [vmem:[%s533_s2 + $0x5] ss:$0 sm:$0xff] }
  0x96   :  { %v66_v38 = vmul.f32 %v65_v37, %v438_v32  ;;  %v67_v39 = vmul.f32 %v57_v36, %v57_v36  ;;  %v69_v48 = vsub.f32 %v39_v10, %v57_v36  ;;  %v158_v10 = vpack.c.bf16 %v154_v8, %v153_v2  ;;  %v344_v8 = vld [vmem:[%s533_s2 + $0x8] ss:$0 sm:$0xff] }
  0x98   :  { %v68_v40 = vsub.f32 %v66_v38, %v67_v39  ;;  %169 = vmatpush.bf16.msra.mxu2 %v158_v10  ;;  %v342_v39 = vld [vmem:[%s533_s2 + $0x6] ss:$0 sm:$0xff] }
  0x9a   :  { %v70_v41 = vadd.f32 1e-05, %v68_v40 }
  0x9c   :  { %349 = vrsqrt.f32 %v70_v41  ;;  %vm77_vm4 = vweird.f32 %v70_v41  ;;  %170 = vmatpush.bf16.msra.mxu2 %v157_v14  ;;  %v345_v14 = vld [vmem:[%s533_s2 + $0x9] ss:$0 sm:$0xff] }
  0xa2   :  { %v350_v42 = vpop.eup %349 }
  0xa3   :  { %v72_v43 = vmul.f32 %v350_v42, %v70_v41  ;;  %vm78_vm3 = vweird.f32 %v350_v42 }
  0xa4   :  { %vm79_vm5 = vmor %vm77_vm4, %vm78_vm3 }
  0xa5   :  { %v73_v44 = vmul.f32 %v350_v42, %v72_v43 }
  0xa7   :  { %v74_v45 = vmul.f32 0.5, %v73_v44 }
  0xa9   :  { %v75_v46 = vsub.f32 1.5, %v74_v45  ;;  %v181_v45 = vpop.permute.xlu0 %180 }
  0xab   :  { %v76_v47 = vmul.f32 %v350_v42, %v75_v46 }
  0xad   :  { %v80_v50 = vsel %vm79_vm5, %v350_v42, %v76_v47 }
  0xae   :  { %v81_v51 = vmul.f32 %v80_v50, %v69_v48  ;;  %v189_v48 = vld [vmem:[%s532_s1 + $0x50] sm:$0xff] }
  0xb0   :  { %v83_v53 = vmul.f32 %v337_v49, %v81_v51  ;;  %v192_v49 = vpack.c.bf16 %v189_v48, %v189_v48  ;;  %v218_v51 = vld [vmem:[%s532_s1 + $0x68] sm:$0xff] }
  0xb2   :  { %v85_v54 = vadd.f32 %v338_v52, %v83_v53  ;;  %v200_v50 = vsel %vm198_vm9, %v192_v49, 0  ;;  %v219_v52 = vld [vmem:[%s532_s1 + $0x70] sm:$0xff]  ;;  %v216_v53 = vld [vmem:[%s532_s1 + $0x58] sm:$0xff] }
  0xb3   :  { %209 = vmatpush.bf16.msra.mxu3 %v200_v50 }
  0xb4   :  { %v86_v55 = vmax.f32 %v85_v54, 0.0  ;;  %v223_v54 = vpack.c.bf16 %v219_v52, %v218_v51 }
  0xb6   :  { %v94_v56 = vpack.c.bf16 %v86_v55, %v86_v55  ;;  %v217_v55 = vld [vmem:[%s532_s1 + $0x60] sm:$0xff]  ;;  %234 = vmatpush.bf16.msrb.mxu0 %v223_v54 }
  0xb8   :  { %327 = vmatmul.msk.bf16.vlgmr.msra.gmra.mxu1 %vm42_vm1, %v94_v56  ;;  %v222_v56 = vpack.c.bf16 %v217_v55, %v216_v53 }
  0xba   :  { %235 = vmatpush.bf16.msrb.mxu0 %v222_v56 }
 0x135   :  { %v110_v58 = vpop.f32.mrf.mxu1 }
 0x136   :  { %v111_v59 = vadd.f32 %v339_v57, %v110_v58 }
 0x138   :  { %v114_v60 = vsel %vm42_vm1, %v111_v59, 0.0  ;;  %v122_v61 = vmul.f32 %v111_v59, %v111_v59 }
 0x139   :  { %v115_v62 = vrot.slane %v114_v60, 4 }
 0x13a   :  { %v123_v63 = vsel %vm42_vm1, %v122_v61, 0.0  ;;  %v245_v61 = vld [vmem:[%s532_s1 + $0x90] sm:$0xff] }
 0x13b   :  { %v116_v0 = vadd.f32 %v115_v62, %v114_v60  ;;  %v124_v1 = vrot.slane %v123_v63, 4  ;;  %v244_v60 = vld [vmem:[%s532_s1 + $0x88] sm:$0xff]  ;;  %v242_v62 = vld [vmem:[%s532_s1 + $0x78] sm:$0xff] }
 0x13d   :  { %v117_v3 = vrot.slane %v116_v0, 2  ;;  %v125_v4 = vadd.f32 %v124_v1, %v123_v63  ;;  %v112_v5 = vpop.f32.mrf.mxu1  ;;  %v249_v63 = vpack.c.bf16 %v245_v61, %v244_v60 }
 0x13f   :  { %v118_v6 = vadd.f32 %v117_v3, %v116_v0  ;;  %v126_v7 = vrot.slane %v125_v4, 2  ;;  %v243_v0 = vld [vmem:[%s532_s1 + $0x80] sm:$0xff]  ;;  %260 = vmatpush.bf16.msrb.mxu3 %v249_v63 }
 0x140   :  { %v248_v1 = vpack.c.bf16 %v243_v0, %v242_v62  ;;  %v343_v3 = vld [vmem:[%s533_s2 + $0x7] ss:$0 sm:$0xff] }
 0x141   :  { %v119_v12 = vrot.slane %v118_v6, 1  ;;  %v127_v13 = vadd.f32 %v126_v7, %v125_v4 }
 0x143   :  { %v120_v15 = vadd.f32 %v119_v12, %v118_v6  ;;  %v128_v16 = vrot.slane %v127_v13, 1  ;;  %261 = vmatpush.bf16.msrb.mxu3 %v248_v1 }
 0x145   :  { %v121_v17 = vmul.f32 %v120_v15, %v438_v32  ;;  %v129_v18 = vadd.f32 %v128_v16, %v127_v13  ;;  %v346_v15 = vld [vmem:[%s533_s2 + $0xa] ss:$0 sm:$0xff]  ;;  %s386_s2 = smov [#allocation2]  }
 0x146   :  { %s315_s19 = sshll.u32 %s386_s2, 4  ;;  %s316_s19 = int_to_ptr.vmem [resolvable:$true] %s315_s19 }
 0x147   :  { %v130_v19 = vmul.f32 %v129_v18, %v438_v32  ;;  %v131_v20 = vmul.f32 %v121_v17, %v121_v17  ;;  %v133_v29 = vsub.f32 %v111_v59, %v121_v17 }
 0x149   :  { %v132_v21 = vsub.f32 %v130_v19, %v131_v20 }
 0x14b   :  { %v134_v22 = vadd.f32 1e-05, %v132_v21 }
 0x14d   :  { %351 = vrsqrt.f32 %v134_v22  ;;  %vm141_vm7 = vweird.f32 %v134_v22 }
 0x153   :  { %v352_v23 = vpop.eup %351 }
 0x154   :  { %v136_v24 = vmul.f32 %v352_v23, %v134_v22  ;;  %vm142_vm6 = vweird.f32 %v352_v23 }
 0x155   :  { %vm143_vm8 = vmor %vm141_vm7, %vm142_vm6 }
 0x156   :  { %v137_v25 = vmul.f32 %v352_v23, %v136_v24 }
 0x158   :  { %v138_v26 = vmul.f32 0.5, %v137_v25 }
 0x15a   :  { %v139_v27 = vsub.f32 1.5, %v138_v26 }
 0x15c   :  { %v140_v28 = vmul.f32 %v352_v23, %v139_v27 }
 0x15e   :  { %v144_v31 = vsel %vm143_vm8, %v352_v23, %v140_v28 }
 0x15f   :  { %v145_v33 = vmul.f32 %v144_v31, %v133_v29 }
 0x161   :  { %v147_v35 = vmul.f32 %v340_v30, %v145_v33 }
 0x163   :  { %v149_v36 = vadd.f32 %v341_v34, %v147_v35 }
 0x165   :  { %v150_v37 = vmax.f32 %v149_v36, 0.0 }
 0x167   :  { %v156_v38 = vpack.c.bf16 %v150_v37, %v150_v37 }
 0x169   :  { %328 = vmatmul.msk.bf16.vlgmr.msra.gmra.mxu2 %vm42_vm1, %v156_v38 }
 0x1ec   :  { %v172_v40 = vpop.f32.mrf.mxu2 }
 0x1ed   :  { %v173_v41 = vadd.f32 %v342_v39, %v172_v40 }
 0x1ef   :  { %v176_v42 = vmul.f32 0.5, %v173_v41  ;;  %303 = vrot.lane.b32.xlu1 %v173_v41, %s385_s20 }
 0x1f1   :  { %v177_v43 = vmul.f32 1.442695, %v176_v42 }
 0x1f3   :  { %353 = vpow2.f32 %v177_v43 }
 0x1f4   :  { %v174_v44 = vpop.f32.mrf.mxu2 }
 0x1f9   :  { %v354_v46 = vpop.eup %353 }
 0x1fa   :  { %v183_v47 = vmul.f32 %v354_v46, %v181_v45 }
 0x1fc   :  { %185 = vrot.lane.b32.xlu0 %v183_v47, %s384_s4 }
 0x261   :  { %v304_v49 = vpop.permute.xlu1 %303 }
 0x26e   :  { %v186_v57 = vpop.permute.xlu0 %185 }
 0x26f   :  { %v188_v58 = vadd.f32 %v186_v57, %v173_v41 }
 0x271   :  { %v191_v59 = vpack.c.bf16 %v188_v58, %v188_v58 }
 0x273   :  { %329 = vmatmul.msk.bf16.vlgmr.msra.gmra.mxu3 %vm194_vm10, %v191_v59 }
 0x2f6   :  { %v211_v4 = vpop.f32.mrf.mxu3 }
 0x2f7   :  { %v212_v5 = vadd.f32 %v343_v3, %v211_v4 }
 0x2f9   :  { %v215_v6 = vmax.f32 %v212_v5, 0.0 }
 0x2fb   :  { %v221_v7 = vpack.c.bf16 %v215_v6, %v215_v6 }
 0x2fd   :  { %330 = vmatmul.msk.bf16.vlgmr.msrb.gmra.mxu0 %vm42_vm1, %v221_v7 }
 0x2fe   :  { %v213_v2 = vpop.f32.mrf.mxu3 }
 0x37a   :  { %v237_v9 = vpop.f32.mrf.mxu0 }
 0x37b   :  { %v238_v10 = vadd.f32 %v344_v8, %v237_v9 }
 0x37d   :  { %v241_v11 = vmax.f32 %v238_v10, 0.0 }
 0x37f   :  { %v247_v12 = vpack.c.bf16 %v241_v11, %v241_v11 }
 0x381   :  { %331 = vmatmul.msk.bf16.vlgmr.msrb.gmra.mxu3 %vm42_vm1, %v247_v12 }
 0x382   :  { %v239_v13 = vpop.f32.mrf.mxu0 }
 0x404   :  { %v263_v16 = vpop.f32.mrf.mxu3 }
 0x405   :  { %v264_v17 = vadd.f32 %v345_v14, %v263_v16 }
 0x407   :  { %v269_v18 = vadd.f32 %v346_v15, %v264_v17 }
 0x409   :  { %v270_v19 = vsel %vm25_vm0, %v269_v18, 0.0  ;;  %v278_v20 = vmul.f32 %v269_v18, %v269_v18 }
 0x40a   :  { %v271_v21 = vrot.slane %v270_v19, 4 }
 0x40b   :  { %v279_v22 = vsel %vm25_vm0, %v278_v20, 0.0 }
 0x40c   :  { %v272_v23 = vadd.f32 %v271_v21, %v270_v19  ;;  %v280_v24 = vrot.slane %v279_v22, 4  ;;  %v265_v25 = vpop.f32.mrf.mxu3 }
 0x40e   :  { %v273_v26 = vrot.slane %v272_v23, 2  ;;  %v281_v27 = vadd.f32 %v280_v24, %v279_v22 }
 0x410   :  { %v274_v28 = vadd.f32 %v273_v26, %v272_v23  ;;  %v282_v29 = vrot.slane %v281_v27, 2 }
 0x412   :  { %v275_v30 = vrot.slane %v274_v28, 1  ;;  %v283_v31 = vadd.f32 %v282_v29, %v281_v27 }
 0x414   :  { %v276_v33 = vadd.f32 %v275_v30, %v274_v28  ;;  %v284_v34 = vrot.slane %v283_v31, 1 }
 0x416   :  { %v277_v35 = vmul.f32 %v276_v33, %v438_v32  ;;  %v285_v36 = vadd.f32 %v284_v34, %v283_v31 }
 0x418   :  { %v286_v37 = vmul.f32 %v285_v36, %v438_v32  ;;  %v287_v38 = vmul.f32 %v277_v35, %v277_v35  ;;  %v289_v47 = vsub.f32 %v269_v18, %v277_v35 }
 0x41a   :  { %v288_v39 = vsub.f32 %v286_v37, %v287_v38 }
 0x41c   :  { %v290_v40 = vadd.f32 1e-05, %v288_v39 }
 0x41e   :  { %355 = vrsqrt.f32 %v290_v40  ;;  %vm297_vm12 = vweird.f32 %v290_v40 }
 0x424   :  { %v356_v41 = vpop.eup %355 }
 0x425   :  { %v292_v42 = vmul.f32 %v356_v41, %v290_v40  ;;  %vm298_vm11 = vweird.f32 %v356_v41 }
 0x426   :  { %vm299_vm13 = vmor %vm297_vm12, %vm298_vm11 }
 0x427   :  { %v293_v43 = vmul.f32 %v356_v41, %v292_v42 }
 0x429   :  { %v294_v44 = vmul.f32 0.5, %v293_v43 }
 0x42b   :  { %v295_v45 = vsub.f32 1.5, %v294_v44 }
 0x42d   :  { %v296_v46 = vmul.f32 %v356_v41, %v295_v45 }
 0x42f   :  { %v300_v48 = vsel %vm299_vm13, %v356_v41, %v296_v46 }
 0x430   :  { %v301_v32 = vmul.f32 %v300_v48, %v289_v47 }
 0x432   :  { %v306_v50 = vsel %vm25_vm0, %v301_v32, %v304_v49 }
 0x433   :  { %v308_v51 = vsel %vm307_vm14, %v306_v50, %v304_v49 }
 0x434   :  { %309 = vst.msk [vmem:[#allocation2] sm:$0xff] %vm42_vm1, %v308_v51 }
 0x435   :  { %320 = dma.vmem_to_hbm [thread:$0]  %s316_s19, 128, %s318_s21, [#allocation3]  }
 0x436   :  { %381 = dma.done.wait [#allocation3], 128  }
 0x437   :  { %382 = vsyncadd [#allocation3], 4294967168 }
 0x438   :  { %325 = vsyncpa [#allocation3], 1 }

</bundles_post_ra>
